<compile_context>
chip_gen: v5e
topology: v5e:2x2
jax: 0.10.0
libtpu: 0.0.40
codegen_flags: <defaults>
</compile_context>

<pallas_src>
import math
from functools import partial

import jax
import jax.numpy as jnp
from jax.experimental import pallas as pl
from jax.experimental.pallas import tpu as pltpu

# Fixed architecture: (out_features, in_features) per layer, plus the row offset of each
# layer's block inside the packed parameter slab (all offsets are multiples of 8).
_LAYERS = ((32, 10), (16, 32), (8, 16), (1, 8))
_ROW_OFF = (0, 32, 48, 56)            # 32 + 16 + 8 + 1 = 57 rows used; slab padded to 64
_SLAB_SHAPE = (64, 128)               # one (8,128)-aligned f32 slab = 32 KiB
_TB_MAX = 65536                       # batch-tile cap (keeps VMEM well under all limits)


def _mlp_kernel(xT_ref, slab_ref, o_ref, *, precision):
    """One batch tile: xT_ref (10, TB), slab_ref (64, 128), o_ref (1, TB)."""
    z = xT_ref[...]                                        # (10, TB), batch on lanes

    # Straight-line, fully unrolled 4-layer body; static ref slices are free.
    for li, (out_f, in_f) in enumerate(_LAYERS):
        r0 = _ROW_OFF[li]
        w = slab_ref[r0:r0 + out_f, 0:in_f]                # (out, in)
        b = slab_ref[r0:r0 + out_f, in_f:in_f + 1]         # (out, 1) -> broadcast over lanes
        z = jnp.dot(w, z, precision=precision,
                    preferred_element_type=jnp.float32) + b
        if li < len(_LAYERS) - 1:
            z = jnp.maximum(z, 0.0)                        # ReLU on fc1..fc3 only

    o_ref[...] = z.astype(o_ref.dtype)                     # (1, TB), lane-dense store


def pack_params(params):
    """Pack [(W, b)] with W:(out,in), b:(out,) into one (64, 128) f32 slab."""
    slab = jnp.zeros(_SLAB_SHAPE, jnp.float32)
    for li, (w, b) in enumerate(params):
        out_f, in_f = _LAYERS[li]
        r0 = _ROW_OFF[li]
        slab = slab.at[r0:r0 + out_f, 0:in_f].set(w.astype(jnp.float32))
        slab = slab.at[r0:r0 + out_f, in_f].set(b.astype(jnp.float32).reshape(out_f))
    return slab


def _choose_tiling(batch):
    """Even batch split: tb (multiple of 128, <= _TB_MAX), padded batch, #tiles."""
    b128 = pl.cdiv(batch, 128) * 128          # minimal lane-aligned batch
    n_tiles = pl.cdiv(b128, _TB_MAX)
    if b128 >= 256:
        # >=2 grid steps so ("parallel",) can use both TensorCores on v7x.
        n_tiles = max(n_tiles, 2)
    tb = pl.cdiv(pl.cdiv(b128, n_tiles), 128) * 128
    b_pad = n_tiles * tb
    return tb, b_pad, n_tiles


def nn_forward(x, params, *, precision=jax.lax.Precision.HIGHEST):
    """x: (B, 10) float32. torch.squeeze semantics: (B,) for B > 1, () for B == 1."""
    B = x.shape[0]
    slab = pack_params(params)
    tb, b_pad, n_tiles = _choose_tiling(B)

    # Batch-on-lanes: single fused pad+transpose (no full zero-fill + scatter).
    # TODO(synk): if the producer can emit x already as (10, B) this pass disappears.
    xT = jnp.pad(x.astype(jnp.float32), ((0, b_pad - B), (0, 0))).T   # (10, b_pad)

    out = pl.pallas_call(
        partial(_mlp_kernel, precision=precision),
        out_shape=jax.ShapeDtypeStruct((1, b_pad), jnp.float32),
        grid_spec=pltpu.PrefetchScalarGridSpec(
            num_scalar_prefetch=0,
            grid=(n_tiles,),
            in_specs=[
                pl.BlockSpec((10, tb), lambda i: (0, i)),        # batch tile of x^T
                pl.BlockSpec(_SLAB_SHAPE, lambda i: (0, 0)),     # packed params, resident
            ],
            out_specs=pl.BlockSpec((1, tb), lambda i: (0, i)),   # lane-dense output tile
        ),
        compiler_params=pltpu.CompilerParams(
            dimension_semantics=("parallel",),                    # both TCs on v7x
        ),
    )(xT, slab)

    # torch.squeeze: drop all size-1 dims.
    return jnp.squeeze(out[:, :B])


def init_params(key):
    """PyTorch nn.Linear default init: W, b ~ U(-1/sqrt(fan_in), +); W stored (out, in)."""
    params = []
    for (out_f, in_f) in _LAYERS:
        key, kw, kb = jax.random.split(key, 3)
        bound = 1.0 / math.sqrt(in_f)
        w = jax.random.uniform(kw, (out_f, in_f), jnp.float32, -bound, bound)
        b = jax.random.uniform(kb, (out_f,), jnp.float32, -bound, bound)
        params.append((w, b))
    return params


def reference_forward(x, params):
    z = x.astype(jnp.float32)
    for li, (w, b) in enumerate(params):
        z = jnp.dot(z, w.T, precision=jax.lax.Precision.HIGHEST) + b
        if li < len(params) - 1:
            z = jnp.maximum(z, 0.0)
    return jnp.squeeze(z)


if __name__ == "__main__":
    key = jax.random.PRNGKey(0)
    kx, kx2, kp = jax.random.split(key, 3)
    params = init_params(kp)

    # Small smoke test (single tile).
    B = 8
    x = jax.random.normal(kx, (B, 10), dtype=jnp.float32)
    y = jax.block_until_ready(nn_forward(x, params))
    y_ref = reference_forward(x, params)
    assert y.shape == (B,), y.shape
    assert jnp.allclose(y, y_ref, atol=1e-5, rtol=1e-5), float(jnp.max(jnp.abs(y - y_ref)))

    # Multi-tile path (2 grid steps, even split, padding sliced off).
    B2 = 300
    x2 = jax.random.normal(kx2, (B2, 10), dtype=jnp.float32)
    y2 = jax.block_until_ready(nn_forward(x2, params))
    y2_ref = reference_forward(x2, params)
    assert y2.shape == (B2,), y2.shape
    assert jnp.allclose(y2, y2_ref, atol=1e-5, rtol=1e-5), float(jnp.max(jnp.abs(y2 - y2_ref)))

    print("KERNEL_OK")
</pallas_src>

<mosaic_0001>
module attributes {stable_mosaic.version = 11 : i64} {
  func.func @_mlp_kernel(%arg0: i32, %arg1: memref<10x128xf32, #tpu.memory_space<vmem>>, %arg2: memref<64x128xf32, #tpu.memory_space<vmem>>, %arg3: memref<1x128xf32, #tpu.memory_space<vmem>>) attributes {dimension_semantics = [#tpu.dimension_semantics<parallel>], iteration_bounds = array<i64: 1>, scalar_prefetch = 0 : i64, scratch_operands = 0 : i64, tpu.core_type = #tpu.core_type<tc>, window_params = [{transform_indices = @transform_0, window_bounds = array<i64: 10, 128>}, {pipeline_mode = #tpu.pipeline_mode<synchronous>, transform_indices = @transform_1, window_bounds = array<i64: 64, 128>}, {transform_indices = @transform_2, window_bounds = array<i64: 1, 128>}]} {
    %c0 = arith.constant 0 : index
    %c0_0 = arith.constant 0 : index
    %0 = vector.load %arg1[%c0, %c0_0] : memref<10x128xf32, #tpu.memory_space<vmem>>, vector<10x128xf32>
    %c0_1 = arith.constant 0 : index
    %c0_2 = arith.constant 0 : index
    %1 = vector.load %arg2[%c0_1, %c0_2] : memref<64x128xf32, #tpu.memory_space<vmem>>, vector<32x10xf32>
    %c0_3 = arith.constant 0 : index
    %c10 = arith.constant 10 : index
    %2 = vector.load %arg2[%c0_3, %c10] : memref<64x128xf32, #tpu.memory_space<vmem>>, vector<32x1xf32>
    %cst = arith.constant dense<0.000000e+00> : vector<32x128xf32>
    %3 = tpu.matmul %1, %0, %cst {dimension_numbers = #tpu.dot_dimension_numbers<[1], [0], [0], [1], [0, 0, 1, 1], [], []>, precision = #tpu.contract_precision<fp32>} : vector<32x10xf32>, vector<10x128xf32>, vector<32x128xf32> -> vector<32x128xf32>
    %4 = vector.broadcast %2 : vector<32x1xf32> to vector<32x128xf32>
    %5 = arith.addf %3, %4 : vector<32x128xf32>
    %cst_4 = arith.constant 0.000000e+00 : f32
    %6 = vector.broadcast %cst_4 : f32 to vector<32x128xf32>
    %7 = arith.maximumf %5, %6 : vector<32x128xf32>
    %c32 = arith.constant 32 : index
    %c0_5 = arith.constant 0 : index
    %8 = vector.load %arg2[%c32, %c0_5] : memref<64x128xf32, #tpu.memory_space<vmem>>, vector<16x32xf32>
    %c32_6 = arith.constant 32 : index
    %c32_7 = arith.constant 32 : index
    %9 = vector.load %arg2[%c32_6, %c32_7] : memref<64x128xf32, #tpu.memory_space<vmem>>, vector<16x1xf32>
    %cst_8 = arith.constant dense<0.000000e+00> : vector<16x128xf32>
    %10 = tpu.matmul %8, %7, %cst_8 {dimension_numbers = #tpu.dot_dimension_numbers<[1], [0], [0], [1], [0, 0, 1, 1], [], []>, precision = #tpu.contract_precision<fp32>} : vector<16x32xf32>, vector<32x128xf32>, vector<16x128xf32> -> vector<16x128xf32>
    %11 = vector.broadcast %9 : vector<16x1xf32> to vector<16x128xf32>
    %12 = arith.addf %10, %11 : vector<16x128xf32>
    %cst_9 = arith.constant 0.000000e+00 : f32
    %13 = vector.broadcast %cst_9 : f32 to vector<16x128xf32>
    %14 = arith.maximumf %12, %13 : vector<16x128xf32>
    %c48 = arith.constant 48 : index
    %c0_10 = arith.constant 0 : index
    %15 = vector.load %arg2[%c48, %c0_10] : memref<64x128xf32, #tpu.memory_space<vmem>>, vector<8x16xf32>
    %c48_11 = arith.constant 48 : index
    %c16 = arith.constant 16 : index
    %16 = vector.load %arg2[%c48_11, %c16] : memref<64x128xf32, #tpu.memory_space<vmem>>, vector<8x1xf32>
    %cst_12 = arith.constant dense<0.000000e+00> : vector<8x128xf32>
    %17 = tpu.matmul %15, %14, %cst_12 {dimension_numbers = #tpu.dot_dimension_numbers<[1], [0], [0], [1], [0, 0, 1, 1], [], []>, precision = #tpu.contract_precision<fp32>} : vector<8x16xf32>, vector<16x128xf32>, vector<8x128xf32> -> vector<8x128xf32>
    %18 = vector.broadcast %16 : vector<8x1xf32> to vector<8x128xf32>
    %19 = arith.addf %17, %18 : vector<8x128xf32>
    %cst_13 = arith.constant 0.000000e+00 : f32
    %20 = vector.broadcast %cst_13 : f32 to vector<8x128xf32>
    %21 = arith.maximumf %19, %20 : vector<8x128xf32>
    %c56 = arith.constant 56 : index
    %c0_14 = arith.constant 0 : index
    %22 = vector.load %arg2[%c56, %c0_14] : memref<64x128xf32, #tpu.memory_space<vmem>>, vector<1x8xf32>
    %c56_15 = arith.constant 56 : index
    %c8 = arith.constant 8 : index
    %23 = vector.load %arg2[%c56_15, %c8] : memref<64x128xf32, #tpu.memory_space<vmem>>, vector<1x1xf32>
    %cst_16 = arith.constant dense<0.000000e+00> : vector<1x128xf32>
    %24 = tpu.matmul %22, %21, %cst_16 {dimension_numbers = #tpu.dot_dimension_numbers<[1], [0], [0], [1], [0, 0, 1, 1], [], []>, precision = #tpu.contract_precision<fp32>} : vector<1x8xf32>, vector<8x128xf32>, vector<1x128xf32> -> vector<1x128xf32>
    %25 = vector.broadcast %23 : vector<1x1xf32> to vector<1x128xf32>
    %26 = arith.addf %24, %25 : vector<1x128xf32>
    %c0_17 = arith.constant 0 : index
    %c0_18 = arith.constant 0 : index
    %27 = vector.load %arg3[%c0_17, %c0_18] : memref<1x128xf32, #tpu.memory_space<vmem>>, vector<1x128xf32>
    tpu.vector_store %arg3[%c0_17, %c0_18], %26 {strides = array<i32>} : memref<1x128xf32, #tpu.memory_space<vmem>>, vector<1x128xf32>,
    return
  }
  func.func @transform_0(%arg0: i32) -> (i32, i32) {
    %c0_i32 = arith.constant 0 : i32
    %c0_i32_0 = arith.constant 0 : i32
    return %c0_i32, %arg0 : i32, i32
  }
  func.func @transform_1(%arg0: i32) -> (i32, i32) {
    %c0_i32 = arith.constant 0 : i32
    %c0_i32_0 = arith.constant 0 : i32
    %c0_i32_1 = arith.constant 0 : i32
    return %c0_i32, %c0_i32_0 : i32, i32
  }
  func.func @transform_2(%arg0: i32) -> (i32, i32) {
    %c0_i32 = arith.constant 0 : i32
    %c0_i32_0 = arith.constant 0 : i32
    return %c0_i32, %arg0 : i32, i32
  }
}

</mosaic_0001>

<bundles_post_ra>
// kernel: tpu_custom_call.1
= control target key start
LH: loop header
LB: loop body
LE: loop exit
PB: predicated region body
PF: predicated region fallthrough
CT: control target
= control target key end

     0   :  { %7 = vsyncpa [#allocation3], 0  ;;  %s1064_s0 = inlined_call_operand.hbm [shape: f32[10,128], index: 0, kind: input, shape index: {}]   ;;  %s1065_s1 = inlined_call_operand.hbm [shape: f32[64,128], index: 1, kind: input, shape index: {}]   ;;  %s1066_s2 = inlined_call_operand.hbm [shape: f32[1,128], index: 2, kind: output, shape index: {}]  }
   0x1   :  { %8 = vsyncpa [#allocation6], 0 }
   0x2   :  { %9 = vsyncpa [#allocation4], 0  ;;  %s14_s11 = sshll.u32 %s1064_s0, 4  ;;  %s1010_s12 = smov [#allocation2]   ;;  %s15_s11 = int_to_ptr.hbm [resolvable:$true] %s14_s11 }
   0x3   :  { %s16_s13 = sshll.u32 %s1010_s12, 4  ;;  %s27_s16 = sshll.u32 %s1065_s1, 4  ;;  %s17_s13 = int_to_ptr.vmem [resolvable:$true] %s16_s13  ;;  %s28_s16 = int_to_ptr.hbm [resolvable:$true] %s27_s16 }
   0x4   :  { %s1011_s17 = smov 128   ;;  %s1012_s18 = smov 8  }
   0x5   :  { %22 = dma.hbm_to_vmem [thread:$0]  %s15_s11, 256, %s17_s13, [#allocation3], %s1011_s17, %s1011_s17, %s1012_s18  }
   0x6   :  { %s1013_s19 = smov [#allocation5]  }
   0x7   :  { %s29_s20 = sshll.u32 %s1013_s19, 4  ;;  %s30_s20 = int_to_ptr.vmem [resolvable:$true] %s29_s20 }
   0x8   :  { %35 = dma.hbm_to_vmem [thread:$0]  %s28_s16, 1024, %s30_s20, [#allocation6], %s1011_s17, %s1011_s17, %s1012_s18  }
   0x9   :  { %1004 = dma.done.wait [#allocation3], 256  }
   0xa   :  { %1005 = vsyncadd [#allocation3], 4294967040 }
   0xb   :  { %1006 = dma.done.wait [#allocation6], 1024  }
   0xc   :  { %1007 = vsyncadd [#allocation6], 4294966272  ;;  %v1014_v0 = vmov 10   ;;  %vm79_vm0 = vcmask 1041408   ;;  %vm70_vm1 = vcmask 80896   ;;  %v44_v2 = vld [vmem:[#allocation2] sm:$0xff] }
   0xd   :  { %927 = vset.pattern.permute.xlu1 %v1014_v0  ;;  %926 = vset.pattern.permute.xlu0 %v1014_v0  ;;  %v45_v1 = vld [vmem:[#allocation2 + $0x8] sm:$0x3]  ;;  %v46_v3 = vld [vmem:[#allocation5] sm:$0xff]  ;;  %v99_v5 = vand.u32 4294901760, %v44_v2  ;;  %v47_v7 = vld [vmem:[#allocation5 + $0x8] sm:$0xff]  ;;  %vm351_vm2 = vcmask 261120  }
   0xe   :  { %v81_v4 = vsel %vm79_vm0, %v45_v1, 0  ;;  %v71_v6 = vsel %vm70_vm1, %v46_v3, 0  ;;  %v49_v8 = vld [vmem:[#allocation5 + $0x18] sm:$0xff]  ;;  %57 = vperm.xlu1 %927, %v47_v7   ;;  %v73_v11 = vsel %vm70_vm1, %v47_v7, 0  ;;  %v48_v12 = vld [vmem:[#allocation5 + $0x10] sm:$0xff]  ;;  %vm580_vm3 = vcmask 130048  }
   0xf   :  { %v97_v9 = vand.u32 4294901760, %v81_v4  ;;  %v1041_v10 = vand.u32 4294901760, %v71_v6  ;;  %67 = vperm.xlu0 %926, %v49_v8   ;;  %v155_v13 = vsub.f32 %v44_v2, %v99_v5  ;;  %v109_v14 = vand.u32 4294901760, %v73_v11  ;;  %s1018_s0 = smov [#allocation7]   ;;  %s906_s23 = sshll.u32 %s1066_s2, 4  ;;  %s907_s23 = int_to_ptr.hbm [resolvable:$true] %s906_s23 }
  0x10   :  { %v75_v19 = vsel %vm70_vm1, %v48_v12, 0  ;;  %v77_v32 = vsel %vm70_vm1, %v49_v8, 0  ;;  %vm749_vm4 = vcmask 64512   ;;  %s904_s1 = sshll.u32 %s1018_s0, 4  ;;  %s905_s1 = int_to_ptr.vmem [resolvable:$true] %s904_s1 }
  0x11   :  { %v149_v15 = vsub.f32 %v81_v4, %v97_v9  ;;  %98 = vmatpush.msra.mxu0 %v97_v9  ;;  %233 = vmatpush.msra.mxu3 %v97_v9  ;;  %v102_v16 = vsub.f32 %v71_v6, %v1041_v10  ;;  %v156_v17 = vand.u32 4294901760, %v155_v13  ;;  %v110_v18 = vsub.f32 %v73_v11, %v109_v14 }
  0x12   :  { %v117_v26 = vand.u32 4294901760, %v75_v19  ;;  %v125_v35 = vand.u32 4294901760, %v77_v32 }
  0x13   :  { %193 = vmatpush.msra.mxu2 %v149_v15  ;;  %100 = vmatpush.msra.mxu0 %v99_v5  ;;  %v103_v20 = vand.u32 4294901760, %v102_v16  ;;  %v150_v21 = vand.u32 4294901760, %v149_v15  ;;  %v157_v22 = vsub.f32 %v155_v13, %v156_v17  ;;  %v111_v25 = vand.u32 4294901760, %v110_v18 }
  0x14   :  { %235 = vmatpush.msra.mxu3 %v99_v5  ;;  %v118_v31 = vsub.f32 %v75_v19, %v117_v26  ;;  %v126_v37 = vsub.f32 %v77_v32, %v125_v35 }
  0x15   :  { %196 = vmatpush.msra.mxu2 %v155_v13  ;;  %v104_v23 = vsub.f32 %v102_v16, %v103_v20  ;;  %v151_v24 = vsub.f32 %v149_v15, %v150_v21  ;;  %239 = vmatmul.f32.vlgmr.msra.gmra.mxu3 %v103_v20  ;;  %v158_v29 = vand.u32 4294901760, %v157_v22  ;;  %v112_v30 = vsub.f32 %v110_v18, %v111_v25 }
  0x16   :  { %199 = vmatmul.f32.vlgmr.msra.gmra.mxu2 %v102_v16  ;;  %278 = vmatpush.msrb.mxu0 %v150_v21  ;;  %v119_v34 = vand.u32 4294901760, %v118_v31  ;;  %v127_v39 = vand.u32 4294901760, %v126_v37  ;;  %v1050_v21 = vld [vmem:[#allocation5 + $0x20] sm:$0xff] }
  0x17   :  { %v105_v27 = vand.u32 4294901760, %v104_v23  ;;  %v152_v28 = vand.u32 4294901760, %v151_v24  ;;  %52 = vperm.xlu1 %927, %v46_v3   ;;  %62 = vperm.xlu0 %926, %v48_v12   ;;  %v113_v33 = vand.u32 4294901760, %v112_v30 }
  0x18   :  { %282 = vmatpush.msrb.mxu0 %v156_v17  ;;  %v120_v36 = vsub.f32 %v118_v31, %v119_v34  ;;  %v128_v40 = vsub.f32 %v126_v37, %v127_v39 }
  0x19   :  { %106 = vmatmul.f32.vlgmr.msra.gmra.mxu0 %v105_v27  ;;  %153 = vmatpush.msra.mxu1 %v152_v28  ;;  %v352_v27 = vsel %vm351_vm2, %v1050_v21, 0 }
  0x1a   :  { %v121_v38 = vand.u32 4294901760, %v120_v36  ;;  %v129_v41 = vand.u32 4294901760, %v128_v40  ;;  %v376_v32 = vand.u32 4294901760, %v352_v27 }
  0x1b   :  { %159 = vmatpush.msra.mxu1 %v158_v29 }
  0x1c   :  { %161 = vmatmul.f32.vlgmr.msra.gmra.mxu1 %v1041_v10 }
  0x1d   :  { %245 = vmatmul.f32.gmra.mxu3 %v111_v25  ;;  %315 = vmatpush.msrb.mxu1 %v97_v9 }
  0x1e   :  { %204 = vmatmul.f32.gmra.mxu2 %v110_v18 }
  0x1f   :  { %317 = vmatpush.msrb.mxu1 %v99_v5 }
  0x21   :  { %114 = vmatmul.f32.gmra.mxu0 %v113_v33 }
  0x24   :  { %165 = vmatmul.f32.gmra.mxu1 %v109_v14 }
  0x25   :  { %251 = vmatmul.f32.gmra.mxu3 %v119_v34 }
  0x26   :  { %209 = vmatmul.f32.gmra.mxu2 %v118_v31 }
  0x29   :  { %122 = vmatmul.f32.gmra.mxu0 %v121_v38  ;;  %v340_v38 = vld [vmem:[#allocation5 + $0x28] sm:$0xff] }
  0x2c   :  { %169 = vmatmul.f32.gmra.mxu1 %v117_v26 }
  0x2d   :  { %257 = vmatmul.f32.gmra.mxu3 %v127_v39  ;;  %v1054_v39 = vsub.f32 %v352_v27, %v376_v32 }
  0x2e   :  { %214 = vmatmul.f32.gmra.mxu2 %v126_v37 }
  0x31   :  { %130 = vmatmul.f32.gmra.mxu0 %v129_v41 }
  0x34   :  { %173 = vmatmul.f32.gmra.mxu1 %v125_v35 }
  0x39   :  { %284 = vmatmul.f32.vlgmr.msrb.gmra.mxu0 %v1041_v10 }
  0x3c   :  { %319 = vmatmul.f32.vlgmr.msrb.gmra.mxu1 %v1041_v10 }
  0x41   :  { %288 = vmatmul.f32.gmra.mxu0 %v109_v14 }
  0x44   :  { %323 = vmatmul.f32.gmra.mxu1 %v109_v14 }
  0x49   :  { %292 = vmatmul.f32.gmra.mxu0 %v117_v26 }
  0x4c   :  { %327 = vmatmul.f32.gmra.mxu1 %v117_v26 }
  0x51   :  { %296 = vmatmul.f32.gmra.mxu0 %v125_v35 }
  0x54   :  { %331 = vmatmul.f32.gmra.mxu1 %v125_v35 }
  0x80   :  { %v58_v51 = vpop.permute.xlu1 %57 }
  0x81   :  { %v68_v49 = vpop.permute.xlu0 %67 }
  0x89   :  { %v63_v55 = vpop.permute.xlu0 %62  ;;  %v53_v58 = vpop.permute.xlu1 %52 }
  0x96   :  { %v107_v42 = vpop.f32.mrf.mxu0 }
  0x97   :  { %v108_v62 = vadd.f32 %v107_v42, %v53_v58 }
  0x98   :  { %v240_v50 = vpop.f32.mrf.mxu3 }
  0x99   :  { %v162_v43 = vpop.f32.mrf.mxu1  ;;  %v200_v47 = vpop.f32.mrf.mxu2 }
  0x9a   :  { %v163_v2 = vadd.f32 %v162_v43, %v108_v62  ;;  %v354_v43 = vsel %vm351_vm2, %v340_v38, 0 }
  0x9c   :  { %v201_v9 = vadd.f32 %v200_v47, %v163_v2 }
  0x9e   :  { %v115_v44 = vpop.f32.mrf.mxu0  ;;  %v241_v13 = vadd.f32 %v240_v50, %v201_v9  ;;  %v384_v50 = vand.u32 4294901760, %v354_v43 }
  0x9f   :  { %v116_v59 = vadd.f32 %v115_v44, %v58_v51 }
  0xa0   :  { %v246_v56 = vpop.f32.mrf.mxu3 }
  0xa1   :  { %v166_v45 = vpop.f32.mrf.mxu1  ;;  %v205_v54 = vpop.f32.mrf.mxu2 }
  0xa2   :  { %v167_v63 = vadd.f32 %v166_v45, %v116_v59 }
  0xa4   :  { %v206_v4 = vadd.f32 %v205_v54, %v167_v63 }
  0xa6   :  { %v123_v46 = vpop.f32.mrf.mxu0  ;;  %v247_v10 = vadd.f32 %v246_v56, %v206_v4 }
  0xa7   :  { %v124_v60 = vadd.f32 %v123_v46, %v63_v55  ;;  %v378_v46 = vand.u32 4294901760, %v1054_v39 }
  0xa8   :  { %v252_v5 = vpop.f32.mrf.mxu3 }
  0xa9   :  { %v170_v48 = vpop.f32.mrf.mxu1  ;;  %v210_v0 = vpop.f32.mrf.mxu2 }
  0xaa   :  { %v171_v1 = vadd.f32 %v170_v48, %v124_v60 }
  0xac   :  { %v211_v6 = vadd.f32 %v210_v0, %v171_v1 }
  0xae   :  { %v131_v52 = vpop.f32.mrf.mxu0  ;;  %v253_v11 = vadd.f32 %v252_v5, %v211_v6 }
  0xaf   :  { %v132_v7 = vadd.f32 %v131_v52, %v68_v49 }
  0xb0   :  { %v258_v22 = vpop.f32.mrf.mxu3 }
  0xb1   :  { %v174_v53 = vpop.f32.mrf.mxu1  ;;  %v215_v14 = vpop.f32.mrf.mxu2 }
  0xb2   :  { %v175_v12 = vadd.f32 %v174_v53, %v132_v7  ;;  %v379_v53 = vsub.f32 %v1054_v39, %v378_v46 }
  0xb4   :  { %v216_v19 = vadd.f32 %v215_v14, %v175_v12  ;;  %v574_v14 = vld [vmem:[#allocation5 + $0x30] sm:$0xff] }
  0xb6   :  { %v285_v57 = vpop.f32.mrf.mxu0  ;;  %v259_v28 = vadd.f32 %v258_v22, %v216_v19  ;;  %v581_v19 = vsel %vm580_vm3, %v574_v14, 0 }
  0xb7   :  { %v286_v18 = vadd.f32 %v285_v57, %v241_v13  ;;  %v385_v57 = vsub.f32 %v354_v43, %v384_v50 }
  0xb9   :  { %v320_v61 = vpop.f32.mrf.mxu1  ;;  %v386_v63 = vand.u32 4294901760, %v385_v57 }
  0xba   :  { %v321_v25 = vadd.f32 %v320_v61, %v286_v18  ;;  %v380_v61 = vand.u32 4294901760, %v379_v53 }
  0xbb   :  { %v387_v2 = vsub.f32 %v385_v57, %v386_v63 }
  0xbc   :  { %v335_v33 = vmax.f32 %v321_v25, 0.0 }
  0xbd   :  { %v388_v4 = vand.u32 4294901760, %v387_v2 }
  0xbe   :  { %v289_v3 = vpop.f32.mrf.mxu0  ;;  %v374_v40 = vand.u32 4294901760, %v335_v33 }
  0xbf   :  { %v290_v15 = vadd.f32 %v289_v3, %v247_v10  ;;  %v1015_v3 = vmov 32  }
  0xc0   :  { %v424_v47 = vsub.f32 %v335_v33, %v374_v40  ;;  %928 = vset.pattern.permute.xlu2 %v1015_v3 }
  0xc1   :  { %v324_v8 = vpop.f32.mrf.mxu1  ;;  %348 = vperm.xlu2 %928, %v340_v38  }
  0xc2   :  { %v325_v23 = vadd.f32 %v324_v8, %v290_v15  ;;  %v425_v56 = vand.u32 4294901760, %v424_v47 }
  0xc4   :  { %v336_v29 = vmax.f32 %v325_v23, 0.0  ;;  %v426_v62 = vsub.f32 %v424_v47, %v425_v56  ;;  %v601_v23 = vand.u32 4294901760, %v581_v19 }
  0xc6   :  { %v293_v16 = vpop.f32.mrf.mxu0  ;;  %v372_v36 = vand.u32 4294901760, %v336_v29  ;;  %v427_v1 = vand.u32 4294901760, %v426_v62 }
  0xc7   :  { %v294_v17 = vadd.f32 %v293_v16, %v253_v11 }
  0xc8   :  { %v418_v44 = vsub.f32 %v336_v29, %v372_v36  ;;  %v602_v29 = vsub.f32 %v581_v19, %v601_v23 }
  0xc9   :  { %v328_v20 = vpop.f32.mrf.mxu1  ;;  %343 = vperm.xlu2 %928, %v1050_v21  }
  0xca   :  { %v329_v24 = vadd.f32 %v328_v20, %v294_v17  ;;  %v419_v52 = vand.u32 4294901760, %v418_v44 }
  0xcc   :  { %v337_v26 = vmax.f32 %v329_v24, 0.0  ;;  %v420_v59 = vsub.f32 %v418_v44, %v419_v52 }
  0xce   :  { %v297_v30 = vpop.f32.mrf.mxu0  ;;  %v370_v34 = vand.u32 4294901760, %v337_v26  ;;  %v421_v0 = vand.u32 4294901760, %v420_v59 }
  0xcf   :  { %v298_v31 = vadd.f32 %v297_v30, %v259_v28 }
  0xd0   :  { %v412_v41 = vsub.f32 %v337_v26, %v370_v34 }
  0xd1   :  { %v332_v35 = vpop.f32.mrf.mxu1 }
  0xd2   :  { %v333_v37 = vadd.f32 %v332_v35, %v298_v31  ;;  %v413_v49 = vand.u32 4294901760, %v412_v41 }
  0xd4   :  { %v338_v42 = vmax.f32 %v333_v37, 0.0  ;;  %v414_v55 = vsub.f32 %v412_v41, %v413_v49  ;;  %v603_v37 = vand.u32 4294901760, %v602_v29 }
  0xd6   :  { %v368_v45 = vand.u32 4294901760, %v338_v42  ;;  %v415_v60 = vand.u32 4294901760, %v414_v55 }
  0xd8   :  { %v406_v48 = vsub.f32 %v338_v42, %v368_v45  ;;  %369 = vmatpush.msrb.mxu2 %v368_v45  ;;  %556 = vmatpush.msra.mxu1 %v368_v45 }
  0xda   :  { %371 = vmatpush.msrb.mxu2 %v370_v34  ;;  %558 = vmatpush.msra.mxu1 %v370_v34  ;;  %v407_v51 = vand.u32 4294901760, %v406_v48 }
  0xdc   :  { %373 = vmatpush.msrb.mxu2 %v372_v36  ;;  %521 = vmatpush.msra.mxu0 %v407_v51  ;;  %v408_v54 = vsub.f32 %v406_v48, %v407_v51 }
  0xdd   :  { %560 = vmatpush.msra.mxu1 %v372_v36 }
  0xde   :  { %375 = vmatpush.msrb.mxu2 %v374_v40  ;;  %525 = vmatpush.msra.mxu0 %v413_v49  ;;  %v409_v58 = vand.u32 4294901760, %v408_v54 }
  0xdf   :  { %562 = vmatpush.msra.mxu1 %v374_v40  ;;  %381 = vmatmul.f32.vlgmr.msrb.gmra.mxu2 %v380_v61  ;;  %v1017_v61 = vmov 8  }
  0xe0   :  { %452 = vmatpush.msra.mxu2 %v406_v48  ;;  %410 = vmatpush.msrb.mxu3 %v409_v58 }
  0xe1   :  { %529 = vmatpush.msra.mxu0 %v419_v52  ;;  %564 = vmatmul.f32.vlgmr.msra.gmra.mxu1 %v376_v32  ;;  %v743_v52 = vld [vmem:[#allocation5 + $0x38] sm:$0x1] }
  0xe2   :  { %455 = vmatpush.msra.mxu2 %v412_v41  ;;  %416 = vmatpush.msrb.mxu3 %v415_v60  ;;  %v604_v41 = vsub.f32 %v602_v29, %v603_v37  ;;  %v750_v54 = vsel %vm749_vm4, %v743_v52, 0 }
  0xe3   :  { %533 = vmatpush.msra.mxu0 %v425_v56  ;;  %930 = vset.pattern.permute.xlu1 %v1017_v61 }
  0xe4   :  { %458 = vmatpush.msra.mxu2 %v418_v44  ;;  %535 = vmatmul.f32.vlgmr.msra.gmra.mxu0 %v376_v32 }
  0xe5   :  { %422 = vmatpush.msrb.mxu3 %v421_v0  ;;  %746 = vperm.xlu1 %930, %v743_v52  }
  0xe6   :  { %461 = vmatpush.msra.mxu2 %v424_v47 }
  0xe7   :  { %428 = vmatpush.msrb.mxu3 %v427_v1  ;;  %389 = vmatmul.f32.gmra.mxu2 %v388_v4 }
  0xe8   :  { %430 = vmatmul.f32.vlgmr.msrb.gmra.mxu3 %v376_v32  ;;  %v1016_v32 = vmov 16  }
  0xe9   :  { %486 = vmatpush.msra.mxu3 %v368_v45  ;;  %568 = vmatmul.f32.gmra.mxu1 %v384_v50  ;;  %v605_v45 = vand.u32 4294901760, %v604_v41 }
  0xea   :  { %929 = vset.pattern.permute.xlu0 %v1016_v32 }
  0xeb   :  { %488 = vmatpush.msra.mxu3 %v370_v34  ;;  %577 = vperm.xlu0 %929, %v574_v14  }
  0xec   :  { %539 = vmatmul.f32.gmra.mxu0 %v384_v50 }
  0xed   :  { %490 = vmatpush.msra.mxu3 %v372_v36 }
  0xef   :  { %492 = vmatpush.msra.mxu3 %v374_v40  ;;  %464 = vmatmul.f32.vlgmr.msra.gmra.mxu2 %v1054_v39 }
  0xf0   :  { %434 = vmatmul.f32.gmra.mxu3 %v384_v50 }
  0xf3   :  { %931 = vset.pattern.permute.xlu0 %v1017_v61 }
  0xf7   :  { %469 = vmatmul.f32.gmra.mxu2 %v385_v57  ;;  %v769_v57 = vand.u32 4294901760, %v750_v54 }
  0xf8   :  { %496 = vmatmul.f32.vlgmr.msra.gmra.mxu3 %v378_v46 }
  0xf9   :  { %v770_v60 = vsub.f32 %v750_v54, %v769_v57 }
  0xfb   :  { %v771_v1 = vand.u32 4294901760, %v770_v60 }
 0x100   :  { %502 = vmatmul.f32.gmra.mxu3 %v386_v63 }
 0x11b   :  { %v349_v5 = vpop.permute.xlu2 %348 }
 0x123   :  { %v344_v9 = vpop.permute.xlu2 %343 }
 0x157   :  { %v747_v14 = vpop.permute.xlu1 %746 }
 0x15d   :  { %v578_v53 = vpop.permute.xlu0 %577 }
 0x15e   :  { %v565_v18 = vpop.f32.mrf.mxu1 }
 0x161   :  { %v536_v15 = vpop.f32.mrf.mxu0 }
 0x162   :  { %v382_v6 = vpop.f32.mrf.mxu2 }
 0x163   :  { %v383_v11 = vadd.f32 %v382_v6, %v344_v9 }
 0x166   :  { %v569_v34 = vpop.f32.mrf.mxu1 }
 0x169   :  { %v540_v31 = vpop.f32.mrf.mxu0 }
 0x16a   :  { %v390_v8 = vpop.f32.mrf.mxu2 }
 0x16b   :  { %v431_v7 = vpop.f32.mrf.mxu3  ;;  %v391_v20 = vadd.f32 %v390_v8, %v349_v5  ;;  %v772_v5 = vsub.f32 %v770_v60, %v771_v1 }
 0x16c   :  { %v432_v12 = vadd.f32 %v431_v7, %v383_v11 }
 0x16d   :  { %v773_v8 = vand.u32 4294901760, %v772_v5 }
 0x172   :  { %v465_v13 = vpop.f32.mrf.mxu2 }
 0x173   :  { %v435_v10 = vpop.f32.mrf.mxu3  ;;  %v466_v16 = vadd.f32 %v465_v13, %v432_v12 }
 0x174   :  { %v436_v24 = vadd.f32 %v435_v10, %v391_v20 }
 0x17a   :  { %v470_v26 = vpop.f32.mrf.mxu2 }
 0x17b   :  { %v497_v17 = vpop.f32.mrf.mxu3  ;;  %v471_v28 = vadd.f32 %v470_v26, %v436_v24 }
 0x17c   :  { %v498_v21 = vadd.f32 %v497_v17, %v466_v16 }
 0x17e   :  { %v537_v22 = vadd.f32 %v536_v15, %v498_v21 }
 0x180   :  { %v566_v25 = vadd.f32 %v565_v18, %v537_v22 }
 0x182   :  { %v572_v27 = vmax.f32 %v566_v25, 0.0 }
 0x183   :  { %v503_v30 = vpop.f32.mrf.mxu3 }
 0x184   :  { %v504_v33 = vadd.f32 %v503_v30, %v471_v28  ;;  %v599_v35 = vand.u32 4294901760, %v572_v27 }
 0x186   :  { %v541_v36 = vadd.f32 %v540_v31, %v504_v33  ;;  %v631_v39 = vsub.f32 %v572_v27, %v599_v35 }
 0x188   :  { %v570_v38 = vadd.f32 %v569_v34, %v541_v36  ;;  %v632_v44 = vand.u32 4294901760, %v631_v39 }
 0x18a   :  { %v573_v40 = vmax.f32 %v570_v38, 0.0  ;;  %v633_v48 = vsub.f32 %v631_v39, %v632_v44 }
 0x18c   :  { %v597_v42 = vand.u32 4294901760, %v573_v40  ;;  %v634_v50 = vand.u32 4294901760, %v633_v48 }
 0x18e   :  { %v625_v43 = vsub.f32 %v573_v40, %v597_v42  ;;  %598 = vmatpush.msrb.mxu2 %v597_v42  ;;  %734 = vmatpush.msrb.mxu1 %v597_v42 }
 0x190   :  { %v626_v46 = vand.u32 4294901760, %v625_v43  ;;  %600 = vmatpush.msrb.mxu2 %v599_v35  ;;  %736 = vmatpush.msrb.mxu1 %v599_v35 }
 0x191   :  { %738 = vmatmul.f32.vlgmr.msrb.gmra.mxu1 %v601_v23  ;;  %606 = vmatmul.f32.vlgmr.msrb.gmra.mxu2 %v605_v45 }
 0x192   :  { %657 = vmatpush.msra.mxu2 %v625_v43  ;;  %v627_v47 = vsub.f32 %v625_v43, %v626_v46  ;;  %709 = vmatpush.msrb.mxu0 %v626_v46 }
 0x194   :  { %660 = vmatpush.msra.mxu2 %v631_v39  ;;  %713 = vmatpush.msrb.mxu0 %v632_v44  ;;  %v628_v49 = vand.u32 4294901760, %v627_v47 }
 0x195   :  { %715 = vmatmul.f32.vlgmr.msrb.gmra.mxu0 %v601_v23 }
 0x196   :  { %629 = vmatpush.msrb.mxu3 %v628_v49 }
 0x198   :  { %635 = vmatpush.msrb.mxu3 %v634_v50 }
 0x199   :  { %637 = vmatmul.f32.vlgmr.msrb.gmra.mxu3 %v601_v23  ;;  %663 = vmatmul.f32.vlgmr.msra.gmra.mxu2 %v602_v29 }
 0x19a   :  { %682 = vmatpush.msra.mxu3 %v597_v42 }
 0x19c   :  { %684 = vmatpush.msra.mxu3 %v599_v35 }
 0x1a1   :  { %688 = vmatmul.f32.vlgmr.msra.gmra.mxu3 %v603_v37 }
 0x20e   :  { %v739_v3 = vpop.f32.mrf.mxu1 }
 0x212   :  { %v716_v0 = vpop.f32.mrf.mxu0 }
 0x214   :  { %v607_v51 = vpop.f32.mrf.mxu2 }
 0x215   :  { %v608_v55 = vadd.f32 %v607_v51, %v578_v53 }
 0x21c   :  { %v638_v56 = vpop.f32.mrf.mxu3  ;;  %v664_v59 = vpop.f32.mrf.mxu2 }
 0x21d   :  { %v639_v58 = vadd.f32 %v638_v56, %v608_v55 }
 0x21f   :  { %v665_v62 = vadd.f32 %v664_v59, %v639_v58 }
 0x224   :  { %v689_v63 = vpop.f32.mrf.mxu3 }
 0x225   :  { %v690_v2 = vadd.f32 %v689_v63, %v665_v62 }
 0x227   :  { %v717_v4 = vadd.f32 %v716_v0, %v690_v2 }
 0x229   :  { %v740_v6 = vadd.f32 %v739_v3, %v717_v4 }
 0x22b   :  { %v742_v7 = vmax.f32 %v740_v6, 0.0 }
 0x22d   :  { %v767_v9 = vand.u32 4294901760, %v742_v7 }
 0x22f   :  { %v794_v10 = vsub.f32 %v742_v7, %v767_v9  ;;  %768 = vmatpush.msrb.mxu2 %v767_v9  ;;  %844 = vmatpush.msra.mxu1 %v767_v9 }
 0x230   :  { %774 = vmatmul.f32.vlgmr.msrb.gmra.mxu2 %v773_v8  ;;  %848 = vmatmul.f32.vlgmr.msra.gmra.mxu1 %v771_v1 }
 0x231   :  { %v795_v11 = vand.u32 4294901760, %v794_v10  ;;  %821 = vmatpush.msra.mxu0 %v794_v10 }
 0x232   :  { %824 = vmatmul.f32.vlgmr.msra.gmra.mxu0 %v770_v60 }
 0x233   :  { %v796_v12 = vsub.f32 %v794_v10, %v795_v11  ;;  %870 = vmatpush.msra.mxu2 %v795_v11 }
 0x235   :  { %v797_v13 = vand.u32 4294901760, %v796_v12 }
 0x237   :  { %798 = vmatpush.msrb.mxu3 %v797_v13 }
 0x238   :  { %872 = vmatmul.f32.vlgmr.msra.gmra.mxu2 %v769_v57  ;;  %800 = vmatmul.f32.vlgmr.msrb.gmra.mxu3 %v769_v57 }
 0x239   :  { %892 = vmatpush.msra.mxu3 %v767_v9 }
 0x240   :  { %894 = vmatmul.f32.vlgmr.msra.gmra.mxu3 %v769_v57 }
 0x2ad   :  { %v849_v20 = vpop.f32.mrf.mxu1 }
 0x2af   :  { %v825_v18 = vpop.f32.mrf.mxu0 }
 0x2b3   :  { %v775_v15 = vpop.f32.mrf.mxu2 }
 0x2b4   :  { %v776_v16 = vadd.f32 %v775_v15, %v747_v14 }
 0x2bb   :  { %v801_v17 = vpop.f32.mrf.mxu3  ;;  %v873_v22 = vpop.f32.mrf.mxu2 }
 0x2bc   :  { %v802_v19 = vadd.f32 %v801_v17, %v776_v16 }
 0x2be   :  { %v826_v21 = vadd.f32 %v825_v18, %v802_v19 }
 0x2c0   :  { %v850_v23 = vadd.f32 %v849_v20, %v826_v21 }
 0x2c2   :  { %v874_v24 = vadd.f32 %v873_v22, %v850_v23 }
 0x2c3   :  { %v895_v25 = vpop.f32.mrf.mxu3 }
 0x2c4   :  { %v896_v26 = vadd.f32 %v895_v25, %v874_v24 }
 0x2c6   :  { %898 = vst [vmem:[#allocation7] sm:$0x1] %v896_v26 }
 0x2c7   :  { %909 = dma.vmem_to_hbm [thread:$0]  %s905_s1, 16, %s907_s23, [#allocation4]  }
 0x2c8   :  { %1008 = dma.done.wait [#allocation4], 16  }
 0x2c9   :  { %1009 = vsyncadd [#allocation4], 4294967280 }
 0x2ca   :  { %914 = vsyncpa [#allocation3], 1 }
 0x2cb   :  { %915 = vsyncpa [#allocation6], 1 }
 0x2cc   :  { %916 = vsyncpa [#allocation4], 1 }

</bundles_post_ra>
